<compile_context>
chip_gen: v7x
topology: tpu7x:2x2x1
jax: 0.10.0
libtpu: 0.0.40
codegen_flags: <defaults>
</compile_context>

<pallas_src>
import functools

import jax
import jax.numpy as jnp
from jax.experimental import pallas as pl
from jax.experimental.pallas import tpu as pltpu

_LANE = 128  # lane width; 128-aligned f32 is the sweet spot on v5e/v6e/v7x.


def _round_up(n, m):
    return ((n + m - 1) // m) * m


def _choose_batch_tile(B, max_tile):
    """Pick a sublane-aligned batch tile; keep >=2 grid steps when possible."""
    B8 = _round_up(B, 8)
    max_tile = max(8, _round_up(max_tile, 8))
    if B8 > max_tile:
        tile = max_tile
    elif B8 >= 16:
        # Small batch: split into two tiles so both v7x TensorCores get work.
        tile = _round_up((B8 + 1) // 2, 8)
    else:
        tile = B8
    grid = pl.cdiv(B8, tile)
    return tile, grid, grid * tile


def _pad_params(weights, biases, lane=_LANE):
    """Zero-pad every layer's output dim (and matching next-layer input dim)
    up to a multiple of `lane`.  First layer's input dim is left unpadded so x
    does not need feature padding."""
    padded_w, padded_b = [], []
    prev_out_pad = weights[0].shape[0]
    for w, b in zip(weights, biases):
        d_in, d_out = w.shape
        d_in_pad = prev_out_pad
        d_out_pad = _round_up(d_out, lane)
        wp = jnp.zeros((d_in_pad, d_out_pad), w.dtype).at[:d_in, :d_out].set(w)
        bp = jnp.zeros((1, d_out_pad), b.dtype).at[:, :d_out].set(b)
        padded_w.append(wp)
        padded_b.append(bp)
        prev_out_pad = d_out_pad
    return padded_w, padded_b


def _fused_mlp_kernel(num_f, num_g, x_ref, *refs):
    """Fused NeuralODE body.

    refs = (fW1, fb1, ..., fWn, fbn, gW1, gb1, ..., gWm, gbm, out_f, out_g)
    Every layer is Linear -> ReLU (matching build_mlp defaults).
    """
    out_f_ref = refs[-2]
    out_g_ref = refs[-1]
    x = x_ref[...]  # [bt, D_in] float32

    def run_mlp(h, base, n_layers):
        for i in range(n_layers):
            w = refs[base + 2 * i][...]       # [D_in_i_pad, D_out_i_pad]
            b = refs[base + 2 * i + 1][...]   # [1, D_out_i_pad]
            h = jnp.dot(h, w, preferred_element_type=jnp.float32) + b
            h = jnp.maximum(h, 0.0)           # ReLU after every layer
        return h

    out_f_ref[...] = run_mlp(x, 0, num_f).astype(out_f_ref.dtype)
    out_g_ref[...] = run_mlp(x, 2 * num_f, num_g).astype(out_g_ref.dtype)


def neural_ode_forward(x, f_params, g_params, *, max_batch_tile=256):
    """Equivalent of NeuralODE.forward: returns (ode_f(x), ode_g(x)).

    f_params / g_params are (weights, biases) lists with weights stored as
    [D_in, D_out] (already transposed relative to PyTorch nn.Linear).
    """
    f_w, f_b = f_params
    g_w, g_b = g_params
    B, D_in = x.shape
    assert f_w[0].shape[0] == D_in and g_w[0].shape[0] == D_in

    out_f_dim = f_w[-1].shape[1]
    out_g_dim = g_w[-1].shape[1]

    # Lane-dense padding of parameters (tiny; done per call for simplicity).
    fw_p, fb_p = _pad_params(f_w, f_b)
    gw_p, gb_p = _pad_params(g_w, g_b)
    out_f_pad = fw_p[-1].shape[1]
    out_g_pad = gw_p[-1].shape[1]

    # Batch tiling + padding.
    bt, grid, B_pad = _choose_batch_tile(B, max_batch_tile)
    if B_pad != B:
        x = jnp.pad(x, ((0, B_pad - B), (0, 0)))

    args = [x]
    in_specs = [pl.BlockSpec((bt, D_in), lambda i: (i, 0))]
    for w, b in zip(fw_p + gw_p, fb_p + gb_p):
        args.extend([w, b])
        # Whole-array, constant-index blocks: fetched once, resident in VMEM.
        in_specs.append(pl.BlockSpec(w.shape, lambda i: (0, 0)))
        in_specs.append(pl.BlockSpec(b.shape, lambda i: (0, 0)))

    kernel = functools.partial(_fused_mlp_kernel, len(fw_p), len(gw_p))
    out_f_full, out_g_full = pl.pallas_call(
        kernel,
        out_shape=(
            jax.ShapeDtypeStruct((B_pad, out_f_pad), jnp.float32),
            jax.ShapeDtypeStruct((B_pad, out_g_pad), jnp.float32),
        ),
        grid=(grid,),
        in_specs=in_specs,
        out_specs=(
            pl.BlockSpec((bt, out_f_pad), lambda i: (i, 0)),
            pl.BlockSpec((bt, out_g_pad), lambda i: (i, 0)),
        ),
        compiler_params=pltpu.CompilerParams(
            dimension_semantics=("parallel",)),
    )(*args)

    return out_f_full[:B, :out_f_dim], out_g_full[:B, :out_g_dim]


def init_mlp_params(key, hidden_dims):
    """Deterministic PyTorch-Linear-like init; weights stored as [D_in, D_out]."""
    weights, biases = [], []
    for i in range(len(hidden_dims) - 1):
        d_in, d_out = hidden_dims[i], hidden_dims[i + 1]
        key, kw, kb = jax.random.split(key, 3)
        bound = 1.0 / (d_in ** 0.5)
        w = jax.random.uniform(kw, (d_in, d_out), jnp.float32, -bound, bound)
        b = jax.random.uniform(kb, (1, d_out), jnp.float32, -bound, bound)
        weights.append(w)
        biases.append(b)
    return key, weights, biases


def _reference_mlp(x, weights, biases):
    h = x
    for w, b in zip(weights, biases):
        h = jnp.maximum(h @ w + b, 0.0)
    return h


if __name__ == "__main__":
    # Small shapes consistent with the module: x is [batch, in_dim].
    params_f = [32, 64, 32]   # ode_f hidden dims
    params_g = [32, 48, 16]   # ode_g hidden dims
    B = 16

    key = jax.random.PRNGKey(0)
    key, f_w, f_b = init_mlp_params(key, params_f)
    key, g_w, g_b = init_mlp_params(key, params_g)
    key, kx = jax.random.split(key)
    x = jax.random.normal(kx, (B, params_f[0]), jnp.float32)

    out_f, out_g = neural_ode_forward(x, (f_w, f_b), (g_w, g_b))
    out_f = jax.block_until_ready(out_f)
    out_g = jax.block_until_ready(out_g)

    # Pure-JAX reference check.
    ref_f = _reference_mlp(x, f_w, f_b)
    ref_g = _reference_mlp(x, g_w, g_b)
    assert out_f.shape == (B, params_f[-1])
    assert out_g.shape == (B, params_g[-1])
    assert jnp.allclose(out_f, ref_f, atol=1e-5, rtol=1e-5)
    assert jnp.allclose(out_g, ref_g, atol=1e-5, rtol=1e-5)

    print("KERNEL_OK")
</pallas_src>

<mosaic_0001>
module attributes {stable_mosaic.version = 11 : i64} {
  func.func @_fused_mlp_kernel(%arg0: i32, %arg1: memref<8x32xf32, #tpu.memory_space<vmem>>, %arg2: memref<32x128xf32, #tpu.memory_space<vmem>>, %arg3: memref<1x128xf32, #tpu.memory_space<vmem>>, %arg4: memref<128x128xf32, #tpu.memory_space<vmem>>, %arg5: memref<1x128xf32, #tpu.memory_space<vmem>>, %arg6: memref<32x128xf32, #tpu.memory_space<vmem>>, %arg7: memref<1x128xf32, #tpu.memory_space<vmem>>, %arg8: memref<128x128xf32, #tpu.memory_space<vmem>>, %arg9: memref<1x128xf32, #tpu.memory_space<vmem>>, %arg10: memref<8x128xf32, #tpu.memory_space<vmem>>, %arg11: memref<8x128xf32, #tpu.memory_space<vmem>>) attributes {dimension_semantics = [#tpu.dimension_semantics<parallel>], iteration_bounds = array<i64: 2>, scalar_prefetch = 0 : i64, scratch_operands = 0 : i64, tpu.core_type = #tpu.core_type<tc>, window_params = [{transform_indices = @transform_0, window_bounds = array<i64: 8, 32>}, {pipeline_mode = #tpu.pipeline_mode<synchronous>, transform_indices = @transform_1, window_bounds = array<i64: 32, 128>}, {pipeline_mode = #tpu.pipeline_mode<synchronous>, transform_indices = @transform_2, window_bounds = array<i64: 1, 128>}, {pipeline_mode = #tpu.pipeline_mode<synchronous>, transform_indices = @transform_3, window_bounds = array<i64: 128, 128>}, {pipeline_mode = #tpu.pipeline_mode<synchronous>, transform_indices = @transform_4, window_bounds = array<i64: 1, 128>}, {pipeline_mode = #tpu.pipeline_mode<synchronous>, transform_indices = @transform_5, window_bounds = array<i64: 32, 128>}, {pipeline_mode = #tpu.pipeline_mode<synchronous>, transform_indices = @transform_6, window_bounds = array<i64: 1, 128>}, {pipeline_mode = #tpu.pipeline_mode<synchronous>, transform_indices = @transform_7, window_bounds = array<i64: 128, 128>}, {pipeline_mode = #tpu.pipeline_mode<synchronous>, transform_indices = @transform_8, window_bounds = array<i64: 1, 128>}, {transform_indices = @transform_9, window_bounds = array<i64: 8, 128>}, {transform_indices = @transform_10, window_bounds = array<i64: 8, 128>}]} {
    %c0 = arith.constant 0 : index
    %c0_0 = arith.constant 0 : index
    %0 = vector.load %arg1[%c0, %c0_0] : memref<8x32xf32, #tpu.memory_space<vmem>>, vector<8x32xf32>
    %c0_1 = arith.constant 0 : index
    %c0_2 = arith.constant 0 : index
    %1 = vector.load %arg2[%c0_1, %c0_2] : memref<32x128xf32, #tpu.memory_space<vmem>>, vector<32x128xf32>
    %c0_3 = arith.constant 0 : index
    %c0_4 = arith.constant 0 : index
    %2 = vector.load %arg3[%c0_3, %c0_4] : memref<1x128xf32, #tpu.memory_space<vmem>>, vector<1x128xf32>
    %cst = arith.constant dense<0.000000e+00> : vector<8x128xf32>
    %3 = tpu.matmul %0, %1, %cst {dimension_numbers = #tpu.dot_dimension_numbers<[1], [0], [0], [1], [0, 0, 1, 1], [], []>} : vector<8x32xf32>, vector<32x128xf32>, vector<8x128xf32> -> vector<8x128xf32>
    %4 = vector.broadcast %2 : vector<1x128xf32> to vector<8x128xf32>
    %5 = arith.addf %3, %4 : vector<8x128xf32>
    %cst_5 = arith.constant 0.000000e+00 : f32
    %6 = vector.broadcast %cst_5 : f32 to vector<8x128xf32>
    %7 = arith.maximumf %5, %6 : vector<8x128xf32>
    %c0_6 = arith.constant 0 : index
    %c0_7 = arith.constant 0 : index
    %8 = vector.load %arg4[%c0_6, %c0_7] : memref<128x128xf32, #tpu.memory_space<vmem>>, vector<128x128xf32>
    %c0_8 = arith.constant 0 : index
    %c0_9 = arith.constant 0 : index
    %9 = vector.load %arg5[%c0_8, %c0_9] : memref<1x128xf32, #tpu.memory_space<vmem>>, vector<1x128xf32>
    %cst_10 = arith.constant dense<0.000000e+00> : vector<8x128xf32>
    %10 = tpu.matmul %7, %8, %cst_10 {dimension_numbers = #tpu.dot_dimension_numbers<[1], [0], [0], [1], [0, 0, 1, 1], [], []>} : vector<8x128xf32>, vector<128x128xf32>, vector<8x128xf32> -> vector<8x128xf32>
    %11 = vector.broadcast %9 : vector<1x128xf32> to vector<8x128xf32>
    %12 = arith.addf %10, %11 : vector<8x128xf32>
    %cst_11 = arith.constant 0.000000e+00 : f32
    %13 = vector.broadcast %cst_11 : f32 to vector<8x128xf32>
    %14 = arith.maximumf %12, %13 : vector<8x128xf32>
    %c0_12 = arith.constant 0 : index
    %c0_13 = arith.constant 0 : index
    %15 = vector.load %arg10[%c0_12, %c0_13] : memref<8x128xf32, #tpu.memory_space<vmem>>, vector<8x128xf32>
    tpu.vector_store %arg10[%c0_12, %c0_13], %14 {strides = array<i32>} : memref<8x128xf32, #tpu.memory_space<vmem>>, vector<8x128xf32>,
    %c0_14 = arith.constant 0 : index
    %c0_15 = arith.constant 0 : index
    %16 = vector.load %arg6[%c0_14, %c0_15] : memref<32x128xf32, #tpu.memory_space<vmem>>, vector<32x128xf32>
    %c0_16 = arith.constant 0 : index
    %c0_17 = arith.constant 0 : index
    %17 = vector.load %arg7[%c0_16, %c0_17] : memref<1x128xf32, #tpu.memory_space<vmem>>, vector<1x128xf32>
    %cst_18 = arith.constant dense<0.000000e+00> : vector<8x128xf32>
    %18 = tpu.matmul %0, %16, %cst_18 {dimension_numbers = #tpu.dot_dimension_numbers<[1], [0], [0], [1], [0, 0, 1, 1], [], []>} : vector<8x32xf32>, vector<32x128xf32>, vector<8x128xf32> -> vector<8x128xf32>
    %19 = vector.broadcast %17 : vector<1x128xf32> to vector<8x128xf32>
    %20 = arith.addf %18, %19 : vector<8x128xf32>
    %cst_19 = arith.constant 0.000000e+00 : f32
    %21 = vector.broadcast %cst_19 : f32 to vector<8x128xf32>
    %22 = arith.maximumf %20, %21 : vector<8x128xf32>
    %c0_20 = arith.constant 0 : index
    %c0_21 = arith.constant 0 : index
    %23 = vector.load %arg8[%c0_20, %c0_21] : memref<128x128xf32, #tpu.memory_space<vmem>>, vector<128x128xf32>
    %c0_22 = arith.constant 0 : index
    %c0_23 = arith.constant 0 : index
    %24 = vector.load %arg9[%c0_22, %c0_23] : memref<1x128xf32, #tpu.memory_space<vmem>>, vector<1x128xf32>
    %cst_24 = arith.constant dense<0.000000e+00> : vector<8x128xf32>
    %25 = tpu.matmul %22, %23, %cst_24 {dimension_numbers = #tpu.dot_dimension_numbers<[1], [0], [0], [1], [0, 0, 1, 1], [], []>} : vector<8x128xf32>, vector<128x128xf32>, vector<8x128xf32> -> vector<8x128xf32>
    %26 = vector.broadcast %24 : vector<1x128xf32> to vector<8x128xf32>
    %27 = arith.addf %25, %26 : vector<8x128xf32>
    %cst_25 = arith.constant 0.000000e+00 : f32
    %28 = vector.broadcast %cst_25 : f32 to vector<8x128xf32>
    %29 = arith.maximumf %27, %28 : vector<8x128xf32>
    %c0_26 = arith.constant 0 : index
    %c0_27 = arith.constant 0 : index
    %30 = vector.load %arg11[%c0_26, %c0_27] : memref<8x128xf32, #tpu.memory_space<vmem>>, vector<8x128xf32>
    tpu.vector_store %arg11[%c0_26, %c0_27], %29 {strides = array<i32>} : memref<8x128xf32, #tpu.memory_space<vmem>>, vector<8x128xf32>,
    return
  }
  func.func @transform_0(%arg0: i32) -> (i32, i32) {
    %c0_i32 = arith.constant 0 : i32
    %c0_i32_0 = arith.constant 0 : i32
    return %arg0, %c0_i32 : i32, i32
  }
  func.func @transform_1(%arg0: i32) -> (i32, i32) {
    %c0_i32 = arith.constant 0 : i32
    %c0_i32_0 = arith.constant 0 : i32
    %c0_i32_1 = arith.constant 0 : i32
    return %c0_i32, %c0_i32_0 : i32, i32
  }
  func.func @transform_2(%arg0: i32) -> (i32, i32) {
    %c0_i32 = arith.constant 0 : i32
    %c0_i32_0 = arith.constant 0 : i32
    %c0_i32_1 = arith.constant 0 : i32
    return %c0_i32, %c0_i32_0 : i32, i32
  }
  func.func @transform_3(%arg0: i32) -> (i32, i32) {
    %c0_i32 = arith.constant 0 : i32
    %c0_i32_0 = arith.constant 0 : i32
    %c0_i32_1 = arith.constant 0 : i32
    return %c0_i32, %c0_i32_0 : i32, i32
  }
  func.func @transform_4(%arg0: i32) -> (i32, i32) {
    %c0_i32 = arith.constant 0 : i32
    %c0_i32_0 = arith.constant 0 : i32
    %c0_i32_1 = arith.constant 0 : i32
    return %c0_i32, %c0_i32_0 : i32, i32
  }
  func.func @transform_5(%arg0: i32) -> (i32, i32) {
    %c0_i32 = arith.constant 0 : i32
    %c0_i32_0 = arith.constant 0 : i32
    %c0_i32_1 = arith.constant 0 : i32
    return %c0_i32, %c0_i32_0 : i32, i32
  }
  func.func @transform_6(%arg0: i32) -> (i32, i32) {
    %c0_i32 = arith.constant 0 : i32
    %c0_i32_0 = arith.constant 0 : i32
    %c0_i32_1 = arith.constant 0 : i32
    return %c0_i32, %c0_i32_0 : i32, i32
  }
  func.func @transform_7(%arg0: i32) -> (i32, i32) {
    %c0_i32 = arith.constant 0 : i32
    %c0_i32_0 = arith.constant 0 : i32
    %c0_i32_1 = arith.constant 0 : i32
    return %c0_i32, %c0_i32_0 : i32, i32
  }
  func.func @transform_8(%arg0: i32) -> (i32, i32) {
    %c0_i32 = arith.constant 0 : i32
    %c0_i32_0 = arith.constant 0 : i32
    %c0_i32_1 = arith.constant 0 : i32
    return %c0_i32, %c0_i32_0 : i32, i32
  }
  func.func @transform_9(%arg0: i32) -> (i32, i32) {
    %c0_i32 = arith.constant 0 : i32
    %c0_i32_0 = arith.constant 0 : i32
    return %arg0, %c0_i32 : i32, i32
  }
  func.func @transform_10(%arg0: i32) -> (i32, i32) {
    %c0_i32 = arith.constant 0 : i32
    %c0_i32_0 = arith.constant 0 : i32
    return %arg0, %c0_i32 : i32, i32
  }
}

</mosaic_0001>

<bundles_post_ra>
// kernel: tpu_custom_call.1
= control target key start
LH: loop header
LB: loop body
LE: loop exit
PB: predicated region body
PF: predicated region fallthrough
CT: control target
= control target key end

     0   :  { %s1978_s0 = inlined_call_operand.hbm [shape: f32[16,32], index: 0, kind: input, shape index: {}]   ;;  %s1979_s1 = inlined_call_operand.hbm [shape: f32[32,128], index: 1, kind: input, shape index: {}]   ;;  %s1980_s2 = inlined_call_operand.vmem [shape: f32[1,128], index: 2, kind: input, shape index: {}]   ;;  %s1981_s3 = inlined_call_operand.hbm [shape: f32[128,128], index: 3, kind: input, shape index: {}]   ;;  %s1982_s4 = inlined_call_operand.vmem [shape: f32[1,128], index: 4, kind: input, shape index: {}]   ;;  %s1983_s5 = inlined_call_operand.hbm [shape: f32[32,128], index: 5, kind: input, shape index: {}]   ;;  %s1984_s6 = inlined_call_operand.vmem [shape: f32[1,128], index: 6, kind: input, shape index: {}]   ;;  %s1985_s7 = inlined_call_operand.hbm [shape: f32[128,128], index: 7, kind: input, shape index: {}]   ;;  %s1986_s8 = inlined_call_operand.vmem [shape: f32[1,128], index: 8, kind: input, shape index: {}]   ;;  %s1987_s9 = inlined_call_operand.hbm [shape: f32[16,128], index: 9, kind: output, shape index: {0}]   ;;  %s1988_s10 = inlined_call_operand.hbm [shape: f32[16,128], index: 10, kind: output, shape index: {1}]  }
   0x1   :  { %1994 = sst [smem:[#allocation19_spill]] %s1978_s0 }
   0x2   :  { %1995 = sst [smem:[#allocation20_spill]] %s1979_s1 }
   0x3   :  { %1996 = sst [smem:[#allocation21_spill]] %s1980_s2 }
   0x4   :  { %1997 = sst [smem:[#allocation22_spill]] %s1987_s9 }
   0x5   :  { %1998 = sst [smem:[#allocation23_spill]] %s1988_s10 }
   0x6   :  { %16 = vsyncpa [#allocation3], 0 }
   0x7   :  { %18 = vsyncpa [#allocation3 + $0x1], 0 }
   0x8   :  { %19 = vsyncpa [#allocation6], 0 }
   0x9   :  { %20 = vsyncpa [#allocation9], 0 }
   0xa   :  { %21 = vsyncpa [#allocation4], 0 }
   0xb   :  { %23 = vsyncpa [#allocation4 + $0x1], 0 }
   0xc   :  { %24 = vsyncpa [#allocation13], 0 }
   0xd   :  { %26 = vsyncpa [#allocation13 + $0x1], 0  ;;  %s1614_s13 = smov 0   ;;  %s1616_s14 = smov 0  }
   0xe   :  { %s1618_s15 = smov 0   ;;  %s1620_s16 = smov 0  }
   0xf LB: > { %s1547_s17 = smov [#allocation5]   ;;  %s1635_s19 = sadd.s32 4294967295, %s1545_s16   ;;  %s1545_s16 = sphi %s1620_s16, %s2024_s16   ;;  %s1541_s15 = sphi %s1618_s15, %s2023_s15   ;;  %s1537_s14 = sphi %s1616_s14, %s2022_s14   ;;  %s1533_s13 = sphi %s1614_s13, %s2021_s13  }
  0x10   : > { %s295_s18 = sshll.u32 %s1547_s17, 4  ;;  %p976_p0 = scmp.ge.s32.totalorder %s1545_s16, 1  ;;  %s1640_s18 = int_to_ptr.vmem [resolvable:$true] %s295_s18 }
  0x11   : > { %p1991_p1 = scmp.eq.s32.totalorder %s1635_s19, 0  ;;  %p283_p2 = scmp.lt.s32.totalorder %s1545_s16, 3 }
  0x12   : > { %s1548_s21 = smov [#allocation8]   ;;  %s1549_s24 = smov [#allocation7]  }
  0x13   : > { %p1642_p3 = pnand %p976_p0, %p283_p2  ;;  %s327_s22 = sshll.u32 %s1548_s21, 4  ;;  %s1655_s22 = int_to_ptr.vmem [resolvable:$true] %s327_s22 }
  0x14   : > { %s311_s25 = sshll.u32 %s1549_s24, 4  ;;  %s2001_s1 = sld [smem:[#allocation20_spill]]  ;;  %s1657_s25 = int_to_ptr.vmem [resolvable:$true] %s311_s25 }
  0x15   : > { %s1999_s20 = scalar_select %p1642_p3, 1, 0 }
  0x16   : > { %p1222_p5 = pneg %p1642_p3 }
  0x18   : > { %p1651_p6 = pnand %p1222_p5, %p1991_p1 }
  0x1a   : > { %s1297_s28 = scalar_lea.hbm %s2001_s1, 512  ;;  %p1667_p8 = pneg %p1651_p6 }
  0x1b   : > { %p1298_p7 = scmp.ne.s32.totalorder %s2001_s1, %s1297_s28  ;;  %p1304_p11 = scmp.lt.u32.totalorder %s1297_s28, %s2001_s1 }
  0x1d   : > { %p1300_p9 = pnand %p1667_p8, %p1298_p7 }
  0x1f   : > { %p1301_p10 = pneg %p1300_p9 }
  0x21   : > { %p1306_p12 = pnand %p1304_p11, %p1301_p10 }
  0x23   : > { %1309 = shalt.err (!%p1306_p12)
}
  0x24   : > { %s1310_s21 = scalar_lea.vmem %s1640_s18, 512  ;;  %p1318_p5 = scmp.lt.s32.totalorder %s1640_s18, %s1640_s18 }
  0x25   : > { %p1311_p13 = scmp.ne.s32.totalorder %s1640_s18, %s1310_s21  ;;  %p1319_p4 = scmp.lt.s32.totalorder %s1310_s21, %s1310_s21 }
  0x27   : > { %p1313_p0 = pnand %p1311_p13, %p1667_p8  ;;  %p1320_p7 = por %p1319_p4, %p1318_p5 }
  0x29   : > { %p1314_p2 = pneg %p1313_p0 }
  0x2b   : > { %p1321_p9 = pnand %p1320_p7, %p1314_p2 }
  0x2d   : > { %1324 = shalt.err (!%p1321_p9)
}
  0x2e   : > { %s1550_s24 = smov 128   ;;  %s1551_s26 = smov 8  }
  0x2f   : > { %1225 = dma.hbm_to_vmem [thread:$0]  (!%p1651_p6), %s2001_s1, 512, %s1640_s18, [#allocation6], %s1550_s24, %s1550_s24, %s1551_s26  }
  0x30   : > { %s1325_s12 = scalar_lea.hbm %s1983_s5, 512 }
  0x31   : > { %p1326_p4 = scmp.ne.s32.totalorder %s1983_s5, %s1325_s12  ;;  %p1332_p12 = scmp.lt.u32.totalorder %s1325_s12, %s1983_s5 }
  0x33   : > { %p1328_p10 = pnand %p1326_p4, %p1667_p8 }
  0x35   : > { %p1329_p11 = pneg %p1328_p10 }
  0x37   : > { %p1334_p13 = pnand %p1332_p12, %p1329_p11 }
  0x39   : > { %1337 = shalt.err (!%p1334_p13)
}
  0x3a   : > { %s1338_s18 = scalar_lea.vmem %s1655_s22, 512  ;;  %p1346_p7 = scmp.lt.s32.totalorder %s1655_s22, %s1655_s22 }
  0x3b   : > { %p1339_p0 = scmp.ne.s32.totalorder %s1655_s22, %s1338_s18  ;;  %p1347_p9 = scmp.lt.s32.totalorder %s1338_s18, %s1338_s18 }
  0x3d   : > { %p1341_p2 = pnand %p1339_p0, %p1667_p8  ;;  %p1348_p4 = por %p1347_p9, %p1346_p7 }
  0x3f   : > { %p1342_p5 = pneg %p1341_p2 }
  0x41   : > { %p1349_p10 = pnand %p1348_p4, %p1342_p5 }
  0x43   : > { %1352 = shalt.err (!%p1349_p10)
}
  0x44   : > { %1231 = dma.hbm_to_vmem [thread:$0]  (!%p1651_p6), %s1983_s5, 512, %s1655_s22, [#allocation9], %s1550_s24, %s1550_s24, %s1551_s26  }
  0x45   : > { %s1353_s29 = scalar_lea.hbm %s1981_s3, 2048 }
  0x46   : > { %p1354_p11 = scmp.ne.s32.totalorder %s1981_s3, %s1353_s29  ;;  %p1360_p0 = scmp.lt.u32.totalorder %s1353_s29, %s1981_s3 }
  0x48   : > { %p1356_p12 = pnand %p1354_p11, %p1667_p8 }
  0x4a   : > { %p1357_p13 = pneg %p1356_p12 }
  0x4c   : > { %p1362_p2 = pnand %p1360_p0, %p1357_p13 }
  0x4e   : > { %1365 = shalt.err (!%p1362_p2)
}
  0x4f   : > { %s1366_s22 = scalar_lea.vmem %s1657_s25, 2048  ;;  %p1374_p4 = scmp.lt.s32.totalorder %s1657_s25, %s1657_s25 }
  0x50   : > { %p1367_p5 = scmp.ne.s32.totalorder %s1657_s25, %s1366_s22  ;;  %p1375_p10 = scmp.lt.s32.totalorder %s1366_s22, %s1366_s22 }
  0x52   : > { %p1369_p7 = pnand %p1367_p5, %p1667_p8  ;;  %p1376_p11 = por %p1375_p10, %p1374_p4 }
  0x54   : > { %p1370_p9 = pneg %p1369_p7 }
  0x56   : > { %p1377_p12 = pnand %p1376_p11, %p1370_p9 }
  0x58   : > { %1380 = shalt.err (!%p1377_p12)
}
  0x59   : > { %1228 = dma.hbm_to_vmem [thread:$0]  (!%p1651_p6), %s1981_s3, 2048, %s1657_s25, [#allocation6], %s1550_s24, %s1550_s24, %s1551_s26  }
  0x5a   : > { %s1552_s10 = smov [#allocation10]   ;;  %s1381_s30 = scalar_lea.hbm %s1985_s7, 2048 }
  0x5b   : > { %s343_s27 = sshll.u32 %s1552_s10, 4  ;;  %p1382_p13 = scmp.ne.s32.totalorder %s1985_s7, %s1381_s30  ;;  %s344_s27 = int_to_ptr.vmem [resolvable:$true] %s343_s27 }
  0x5c   : > { %p1388_p5 = scmp.lt.u32.totalorder %s1381_s30, %s1985_s7 }
  0x5d   : > { %p1384_p0 = pnand %p1382_p13, %p1667_p8 }
  0x5f   : > { %p1385_p2 = pneg %p1384_p0 }
  0x61   : > { %p1390_p7 = pnand %p1388_p5, %p1385_p2 }
  0x63   : > { %1393 = shalt.err (!%p1390_p7)
}
  0x64   : > { %s1394_s25 = scalar_lea.vmem %s344_s27, 2048  ;;  %p1402_p11 = scmp.lt.s32.totalorder %s344_s27, %s344_s27 }
  0x65   : > { %p1395_p9 = scmp.ne.s32.totalorder %s344_s27, %s1394_s25  ;;  %p1403_p12 = scmp.lt.s32.totalorder %s1394_s25, %s1394_s25 }
  0x67   : > { %p1397_p4 = pnand %p1395_p9, %p1667_p8  ;;  %p1404_p1 = por %p1403_p12, %p1402_p11 }
  0x69   : > { %p1398_p10 = pneg %p1397_p4 }
  0x6b   : > { %p1405_p3 = pnand %p1404_p1, %p1398_p10 }
  0x6d   : > { %1408 = shalt.err (!%p1405_p3)
}
  0x6e   : > { %1234 = dma.hbm_to_vmem [thread:$0]  (!%p1651_p6), %s1985_s7, 2048, %s344_s27, [#allocation9], %s1550_s24, %s1550_s24, %s1551_s26  }
  0x6f   : > { %s975_s23 = sadd.s32 4294967294, %s1545_s16   ;;  %s1766_s11 = sadd.s32 1, %s1545_s16  }
  0x70   : > { %s36_s10 = ssub.s32 %s1545_s16, %s1766_s11  ;;  %s39_s28 = sadd.s32 1, %s1541_s15 }
  0x71   : > { %p37_p1 = scmp.eq.s32.totalorder %s36_s10, 0  ;;  %p46_p3 = scmp.ne.s32.totalorder %s1541_s15, %s1537_s14 }
  0x72   : > { %p47_p8 = scmp.eq.s32.totalorder %s1545_s16, 0  ;;  %p52_p13 = scmp.ne.s32.totalorder %s1537_s14, %s1533_s13 }
  0x73   : > { %s1777_s29 = scalar_select %p37_p1, %s1541_s15, %s39_s28  }
  0x74   : > { %p1779_p0 = por %p47_p8, %p46_p3  ;;  %p2004_p2 = scmp.eq.s32.totalorder %s1635_s19, 0 }
  0x75   : > { %p244_p5 = scmp.eq.s32.totalorder %s1635_s19, 1  ;;  %p250_p7 = scmp.eq.s32.totalorder %s975_s23, 1 }
  0x76   : > { %p1785_p6 = por %p2004_p2, %p52_p13  ;;  %p1250_p9 = scmp.lt.s32.totalorder %s1545_s16, 2 }
  0x77   : > { %s360_s26 = sand.u32 1, %s1541_s15   ;;  %p1792_p4 = por %p244_p5, %p46_p3 }
  0x78   : > { %p1796_p10 = por %p250_p7, %p52_p13  ;;  %s982_s17 = sshll.u32 %s360_s26, 3 }
  0x79   : > { %s2006_s27 = scalar_select %p1792_p4, 1, 0 }
  0x7a   : > { %s2007_s12 = scalar_select %p1796_p10, 1, 0 }
  0x7b   : > { %s983_s21 = sshll.u32 %s1545_s16, 7  ;;  %s2008_s0 = sld [smem:[#allocation19_spill]] }
  0x7c   : > { %s364_s9 = scalar_lea.vmem [#allocation2], %s982_s17  ;;  %p1810_p11 = pnand %p1250_p9, %p1779_p0 }
  0x7d   : > { %s371_s23 = sshll.u32 %s364_s9, 4  ;;  %s361_s28 = scalar_lea.sflag [#allocation3], %s360_s26  ;;  %s1806_s23 = int_to_ptr.vmem [resolvable:$true] %s371_s23 }
  0x7e   : > { %p1411_p1 = pneg %p1810_p11 }
  0x81   : > { %s1804_s18 = scalar_lea.hbm %s2008_s0, %s983_s21  ;;  %s1414_s22 = scalar_lea.hbm %s2008_s0, 256 }
  0x82   : > { %s1409_s1 = scalar_lea.hbm %s1804_s18, 128  ;;  %p1415_p13 = scmp.lt.u32.totalorder %s1804_s18, %s2008_s0 }
  0x83   : > { %p1410_p12 = scmp.ne.s32.totalorder %s1804_s18, %s1409_s1  ;;  %p1416_p0 = scmp.lt.u32.totalorder %s1414_s22, %s1409_s1 }
  0x84   : > { %p1418_p5 = scmp.lt.u32.totalorder %s1409_s1, %s1804_s18 }
  0x85   : > { %p1412_p3 = pnand %p1411_p1, %p1410_p12  ;;  %p1417_p2 = por %p1416_p0, %p1415_p13 }
  0x87   : > { %p1413_p8 = pneg %p1412_p3  ;;  %p1419_p7 = por %p1418_p5, %p1417_p2 }
  0x89   : > { %p1420_p9 = pnand %p1419_p7, %p1413_p8 }
  0x8b   : > { %1423 = shalt.err (!%p1420_p9)
}
  0x8c   : > { %s1424_s26 = scalar_lea.vmem %s1806_s23, 128  ;;  %s1553_s9 = smov [#allocation2]  }
  0x8d   : > { %p1425_p12 = scmp.ne.s32.totalorder %s1806_s23, %s1424_s26  ;;  %s1429_s17 = sshll.u32 %s1553_s9, 4  ;;  %s1430_s17 = int_to_ptr.vmem [resolvable:$false] %s1429_s17 }
  0x8e   : > { %s1431_s21 = scalar_lea.vmem %s1430_s17, 256  ;;  %p1432_p4 = scmp.lt.s32.totalorder %s1806_s23, %s1430_s17 }
  0x8f   : > { %p1427_p3 = pnand %p1425_p12, %p1411_p1  ;;  %p1433_p13 = scmp.lt.s32.totalorder %s1431_s21, %s1424_s26 }
  0x91   : > { %p1428_p10 = pneg %p1427_p3  ;;  %p1434_p0 = por %p1433_p13, %p1432_p4 }
  0x93   : > { %p1435_p2 = pnand %p1434_p0, %p1428_p10 }
  0x95   : > { %1438 = shalt.err (!%p1435_p2)
}
  0x96   : > { %1238 = dma.hbm_to_vmem [thread:$0]  (!%p1810_p11), %s1804_s18, 128, %s1806_s23, %s361_s28  }
  0x97   : > { %p2010_p8 = scmp.ne.s32.totalorder %s1999_s20, 0 }
  0x98   : > { %s1842_s1 = sand.u32 (!%p2010_p8), 1, %s1537_s14  }
  0x99   : > { %380 = sbr.rel (%p2010_p8) target bundleno = 647 (0x287), region = 56  ;;  %s1845_s22 = sshll.u32 (!%p2010_p8), %s1842_s1, 3 }
  0x9a   : > { %s383_s30 = scalar_lea.sflag (!%p2010_p8), [#allocation3], %s1842_s1  ;;  %s386_s25 = scalar_lea.vmem (!%p2010_p8), [#allocation2], %s1845_s22 }
  0xa0   : > { %1512 = dma.done.wait (%p1785_p6), %s383_s30, 128  }
  0xa1   : > { %1514 = vsyncadd (%p1785_p6), %s383_s30, 4294967168  ;;  %p2011_p4 = scmp.eq.s32.totalorder %s1635_s19, 0 }
  0xa3   : > { %1516 = dma.done.wait (%p2011_p4), [#allocation6], 2560   ;;  %p2012_p10 = pmov %p2011_p4 }
  0xa4   : > { %p2013_p11 = pmov %p2011_p4 }
  0xa5   : > { %1518 = vsyncadd (%p2012_p10), [#allocation6], 4294964736 }
  0xa6   : > { %1520 = dma.done.wait (%p2013_p11), [#allocation9], 2560   ;;  %p2014_p1 = pmov %p2011_p4 }
  0xa7   : > { %v1554_v0 = vmov 0.0|0.0   ;;  %vm1555_vm0 = vmmov 0   ;;  %v1556_v1 = vmov 0.0   ;;  %v445_v2 = vld [vmem:[#allocation5] sm:$0xff]  ;;  %v446_v3 = vld [vmem:[#allocation5 + $0x8] sm:$0xff]  ;;  %v447_v7 = vld [vmem:[#allocation5 + $0x10] sm:$0xff] }
  0xa8   : > { %1522 = vsyncadd (%p2014_p1), [#allocation9], 4294964736  ;;  %1140 = vmatprep.subr.bf16.mxu1 %v1554_v0  ;;  %1170 = vmatprep.subr.bf16.mxu0 %v1554_v0  ;;  %v626_v4 = vld [vmem:[#allocation8] sm:$0xff]  ;;  %v1141_v5 = vpack.c.bf16 %v446_v3, %v445_v2  ;;  %v627_v6 = vld [vmem:[#allocation8 + $0x8] sm:$0xff]  ;;  %vm456_vm1 = vcmask 261120   ;;  %s2015_s2 = sld [smem:[#allocation21_spill]] }
  0xa9   : > { %1056 = vmatprep.mubr.msk.f32.mxu1 %vm1555_vm0, %v1556_v1  ;;  %1102 = vmatprep.mubr.msk.f32.mxu0 %vm1555_vm0, %v1556_v1  ;;  %v448_v8 = vld [vmem:[#allocation5 + $0x18] sm:$0xff]  ;;  %v1171_v9 = vpack.c.bf16 %v627_v6, %v626_v4  ;;  %v628_v10 = vld [vmem:[#allocation8 + $0x10] sm:$0xff]  ;;  %v531_v14 = vld [vmem:[#allocation7] sm:$0xff]  ;;  %s1000_s17 = sshll.u32 %s1635_s19, 7  ;;  %s436_s21 = scalar_lea.vmem [#allocation11], %s1845_s22 }
  0xaa   : > { %v629_v11 = vld [vmem:[#allocation8 + $0x18] sm:$0xff]  ;;  %1142 = vmatpush3.bf16.msra.mxu1 %v1141_v5  ;;  %v1144_v12 = vpack.c.bf16 %v448_v8, %v447_v7  ;;  %v532_v15 = vld [vmem:[#allocation7 + $0x8] sm:$0xff]  ;;  %v708_v16 = vld [vmem:[#allocation10] sm:$0xff]  ;;  %s822_s30 = sshll.u32 %s436_s21, 4  ;;  %s2016_s23 = sld [smem:[#allocation22_spill]]  ;;  %s1907_s30 = int_to_ptr.vmem [resolvable:$true] %s822_s30 }
  0xab   : > { %1172 = vmatpush3.bf16.msra.mxu0 %v1171_v9  ;;  %1143 = vmatprep.subr.bf16.mxu1 %v1554_v0  ;;  %v1174_v13 = vpack.c.bf16 %v629_v11, %v628_v10  ;;  %v709_v17 = vld [vmem:[#allocation10 + $0x8] sm:$0xff]  ;;  %v444_v18 = vld [vmem:[%s386_s25] sm:$0xff]  ;;  %v1147_v19 = vpack.c.bf16 %v532_v15, %v531_v14  ;;  %v535_v27 = vld [vmem:[#allocation7 + $0x20] sm:$0xff]  ;;  %s443_s25 = scalar_lea.vmem [#allocation12], %s1845_s22  ;;  %s2017_s26 = sld [smem:[#allocation23_spill]] }
  0xac   : > { %1173 = vmatprep.subr.bf16.mxu0 %v1554_v0  ;;  %v1177_v20 = vpack.c.bf16 %v709_v17, %v708_v16  ;;  %v533_v21 = vld [vmem:[#allocation7 + $0x10] sm:$0xff]  ;;  %v534_v22 = vld [vmem:[#allocation7 + $0x18] sm:$0xff]  ;;  %v536_v28 = vld [vmem:[#allocation7 + $0x28] sm:$0xff]  ;;  %s835_s20 = sshll.u32 %s443_s25, 4  ;;  %s804_s22 = scalar_lea.sflag [#allocation4], %s1842_s1  ;;  %s1914_s20 = int_to_ptr.vmem [resolvable:$true] %s835_s20 }
  0xad   : > { %v710_v23 = vld [vmem:[#allocation10 + $0x10] sm:$0xff]  ;;  %v711_v24 = vld [vmem:[#allocation10 + $0x18] sm:$0xff]  ;;  %v1150_v25 = vpack.c.bf16 %v534_v22, %v533_v21  ;;  %v712_v29 = vld [vmem:[#allocation10 + $0x20] sm:$0xff]  ;;  %v1153_v31 = vpack.c.bf16 %v536_v28, %v535_v27  ;;  %s1439_s24 = scalar_lea.vmem %s1907_s30, 128  ;;  %p2018_p5 = scmp.ne.s32.totalorder %s2006_s27, 0 }
  0xae   : > { %1145 = vmatpush3.bf16.msra.mxu1 %v1144_v12  ;;  %v1180_v26 = vpack.c.bf16 %v711_v24, %v710_v23  ;;  %v713_v30 = vld [vmem:[#allocation10 + $0x28] sm:$0xff]  ;;  %v537_v33 = vld [vmem:[#allocation7 + $0x30] sm:$0xff]  ;;  %v538_v34 = vld [vmem:[#allocation7 + $0x38] sm:$0xff]  ;;  %p1440_p6 = scmp.ne.s32.totalorder %s1907_s30, %s1439_s24  ;;  %s1557_s18 = smov [#allocation11]  }
  0xaf   : > { %1175 = vmatpush3.bf16.msra.mxu0 %v1174_v13  ;;  %1146 = vmatprep.subr.bf16.mxu1 %v1554_v0  ;;  %v1183_v32 = vpack.c.bf16 %v713_v30, %v712_v29  ;;  %v714_v35 = vld [vmem:[#allocation10 + $0x30] sm:$0xff]  ;;  %v715_v36 = vld [vmem:[#allocation10 + $0x38] sm:$0xff]  ;;  %v1156_v37 = vpack.c.bf16 %v538_v34, %v537_v33  ;;  %v539_v39 = vld [vmem:[#allocation7 + $0x40] sm:$0xff]  ;;  %s1443_s0 = sshll.u32 %s1557_s18, 4  ;;  %s1444_s0 = int_to_ptr.vmem [resolvable:$false] %s1443_s0 }
  0xb0   : > { %1176 = vmatprep.subr.bf16.mxu0 %v1554_v0  ;;  %v1186_v38 = vpack.c.bf16 %v715_v36, %v714_v35  ;;  %v540_v40 = vld [vmem:[#allocation7 + $0x48] sm:$0xff]  ;;  %v716_v41 = vld [vmem:[#allocation10 + $0x40] sm:$0xff]  ;;  %v541_v45 = vld [vmem:[#allocation7 + $0x50] sm:$0xff]  ;;  %s1905_s10 = scalar_lea.hbm %s2016_s23, %s1000_s17  ;;  %p1441_p7 = pnand %p1440_p6, %p2018_p5 }
  0xb1   : > { %1057 = vmatmul.mubr.msk.f32.vlgmr.msra.gmra.mrb[0].mxu1 %vm456_vm1, %v444_v18  ;;  %v717_v42 = vld [vmem:[#allocation10 + $0x48] sm:$0xff]  ;;  %v1159_v43 = vpack.c.bf16 %v540_v40, %v539_v39  ;;  %v542_v46 = vld [vmem:[#allocation7 + $0x58] sm:$0xff]  ;;  %v718_v47 = vld [vmem:[#allocation10 + $0x50] sm:$0xff]  ;;  %s1912_s9 = scalar_lea.hbm %s2017_s26, %s1000_s17  ;;  %p1446_p12 = scmp.lt.s32.totalorder %s1907_s30, %s1444_s0 }
  0xb2   : > { %1103 = vmatmul.mubr.msk.f32.vlgmr.msra.gmra.mrb[0].mxu0 %vm456_vm1, %v444_v18  ;;  %1148 = vmatpush3.bf16.msra.mxu1 %v1147_v19  ;;  %v1189_v44 = vpack.c.bf16 %v717_v42, %v716_v41  ;;  %v719_v48 = vld [vmem:[#allocation10 + $0x58] sm:$0xff]  ;;  %v1162_v49 = vpack.c.bf16 %v542_v46, %v541_v45  ;;  %v543_v51 = vld [vmem:[#allocation7 + $0x60] sm:$0xff]  ;;  %v544_v52 = vld [vmem:[#allocation7 + $0x68] sm:$0xff]  ;;  %p1442_p9 = pneg %p1441_p7 }
  0xb3   : > { %1178 = vmatpush3.bf16.msra.mxu0 %v1177_v20  ;;  %1149 = vmatprep.subr.bf16.mxu1 %v1554_v0  ;;  %v1192_v50 = vpack.c.bf16 %v719_v48, %v718_v47  ;;  %v720_v53 = vld [vmem:[#allocation10 + $0x60] sm:$0xff]  ;;  %v721_v54 = vld [vmem:[#allocation10 + $0x68] sm:$0xff]  ;;  %v1165_v55 = vpack.c.bf16 %v544_v52, %v543_v51  ;;  %v545_v57 = vld [vmem:[#allocation7 + $0x70] sm:$0xff] }
  0xb4   : > { %1179 = vmatprep.subr.bf16.mxu0 %v1554_v0  ;;  %1091 = vmatprep.mubr.msk.f32.mxu1 %vm1555_vm0, %v1556_v1  ;;  %v1195_v56 = vpack.c.bf16 %v721_v54, %v720_v53  ;;  %v546_v58 = vld [vmem:[#allocation7 + $0x78] sm:$0xff]  ;;  %v722_v59 = vld [vmem:[#allocation10 + $0x70] sm:$0xff] }
  0xb5   : > { %1137 = vmatprep.mubr.msk.f32.mxu0 %vm1555_vm0, %v1556_v1  ;;  %v1168_v60 = vpack.c.bf16 %v546_v58, %v545_v57  ;;  %v723_v61 = vld [vmem:[#allocation10 + $0x78] sm:$0xff]  ;;  %v992_v63 = vld [vmem:[%s2015_s2] ss:$0 sm:$0xff]  ;;  %s1445_s2 = scalar_lea.vmem %s1444_s0, 256 }
  0xb6   : > { %1151 = vmatpush3.bf16.msra.mxu1 %v1150_v25  ;;  %v1198_v62 = vpack.c.bf16 %v723_v61, %v722_v59  ;;  %v995_v1 = vld [vmem:[%s1984_s6] ss:$0 sm:$0xff]  ;;  %p1447_p3 = scmp.lt.s32.totalorder %s1445_s2, %s1439_s24 }
  0xb7   : > { %1181 = vmatpush3.bf16.msra.mxu0 %v1180_v26  ;;  %1152 = vmatprep.subr.bf16.mxu1 %v1554_v0  ;;  %v994_v9 = vld [vmem:[%s1982_s4] ss:$0 sm:$0xff] }
  0xb8   : > { %1182 = vmatprep.subr.bf16.mxu0 %v1554_v0  ;;  %v997_v10 = vld [vmem:[%s1986_s8] ss:$0 sm:$0xff]  ;;  %p1448_p13 = por %p1447_p3, %p1446_p12 }
  0xba   : > { %1154 = vmatpush3.bf16.msra.mxu1 %v1153_v31  ;;  %p1449_p0 = pnand %p1448_p13, %p1442_p9 }
  0xbb   : > { %1184 = vmatpush3.bf16.msra.mxu0 %v1183_v32  ;;  %1155 = vmatprep.subr.bf16.mxu1 %v1554_v0 }
  0xbc   : > { %1185 = vmatprep.subr.bf16.mxu0 %v1554_v0 }
  0xbe   : > { %1157 = vmatpush3.bf16.msra.mxu1 %v1156_v37 }
  0xbf   : > { %1187 = vmatpush3.bf16.msra.mxu0 %v1186_v38  ;;  %1158 = vmatprep.subr.bf16.mxu1 %v1554_v0 }
  0xc0   : > { %1188 = vmatprep.subr.bf16.mxu0 %v1554_v0 }
  0xc2   : > { %1160 = vmatpush3.bf16.msra.mxu1 %v1159_v43 }
  0xc3   : > { %1190 = vmatpush3.bf16.msra.mxu0 %v1189_v44  ;;  %1161 = vmatprep.subr.bf16.mxu1 %v1554_v0 }
  0xc4   : > { %1191 = vmatprep.subr.bf16.mxu0 %v1554_v0 }
  0xc6   : > { %1163 = vmatpush3.bf16.msra.mxu1 %v1162_v49 }
  0xc7   : > { %1193 = vmatpush3.bf16.msra.mxu0 %v1192_v50  ;;  %1164 = vmatprep.subr.bf16.mxu1 %v1554_v0 }
  0xc8   : > { %1194 = vmatprep.subr.bf16.mxu0 %v1554_v0 }
  0xca   : > { %1166 = vmatpush3.bf16.msra.mxu1 %v1165_v55 }
  0xcb   : > { %1196 = vmatpush3.bf16.msra.mxu0 %v1195_v56  ;;  %1167 = vmatprep.subr.bf16.mxu1 %v1554_v0 }
  0xcc   : > { %1197 = vmatprep.subr.bf16.mxu0 %v1554_v0 }
  0xce   : > { %1169 = vmatpush3.bf16.msra.mxu1 %v1168_v60 }
  0xcf   : > { %1199 = vmatpush3.bf16.msra.mxu0 %v1198_v62 }
 0x184   : > { %v526_v2 = vpop.f32.mrb[0].mxu1 }
 0x185   : > { %v527_v0 = vadd.f32 %v992_v63, %v526_v2  ;;  %v703_v3 = vpop.f32.mrb[0].mxu0  ;;  %v1058_v4 = vpop.f32.mrb[1].mxu1 }
 0x186   : > { %v704_v5 = vadd.f32 %v995_v1, %v703_v3  ;;  %v1104_v6 = vpop.f32.mrb[1].mxu0 }
 0x187   : > { %v530_v7 = vmax.f32 %v527_v0, 0.0 }
 0x188   : > { %v707_v8 = vmax.f32 %v704_v5, 0.0 }
 0x189   : > { %1092 = vmatmul.mubr.f32.vlgmr.msra.gmra.mrb[2].mxu1 %v530_v7 }
 0x18a   : > { %1138 = vmatmul.mubr.f32.vlgmr.msra.gmra.mrb[2].mxu0 %v707_v8 }
 0x25c   : > { %v620_v11 = vpop.f32.mrb[2].mxu1 }
 0x25d   : > { %v621_v12 = vadd.f32 %v994_v9, %v620_v11  ;;  %v797_v13 = vpop.f32.mrb[2].mxu0  ;;  %v1093_v14 = vpop.f32.mrb[3].mxu1 }
 0x25e   : > { %v798_v15 = vadd.f32 %v997_v10, %v797_v13  ;;  %v1139_v16 = vpop.f32.mrb[3].mxu0 }
 0x25f   : > { %v624_v17 = vmax.f32 %v621_v12, 0.0 }
 0x260   : > { %v801_v18 = vmax.f32 %v798_v15, 0.0 }
 0x261   : > { %625 = vst [vmem:[%s436_s21] sm:$0xff] %v624_v17 }
 0x262   : > { %802 = vst [vmem:[%s443_s25] sm:$0xff] %v801_v18 }
 0x263   : > { %1452 = shalt.err (!%p1449_p0)
}
 0x264   : > { %s1453_s17 = scalar_lea.hbm %s1905_s10, 128  ;;  %s1457_s19 = scalar_lea.hbm %s2016_s23, 256 }
 0x265   : > { %p1454_p2 = scmp.ne.s32.totalorder %s1905_s10, %s1453_s17  ;;  %p1458_p10 = scmp.lt.u32.totalorder %s1905_s10, %s2016_s23 }
 0x266   : > { %p1459_p11 = scmp.lt.u32.totalorder %s1457_s19, %s1453_s17  ;;  %p1461_p6 = scmp.lt.u32.totalorder %s1453_s17, %s1905_s10 }
 0x267   : > { %p1455_p8 = pnand %p1454_p2, %p2018_p5 }
 0x268   : > { %p1460_p1 = por %p1459_p11, %p1458_p10 }
 0x269   : > { %p1456_p4 = pneg %p1455_p8 }
 0x26a   : > { %p1462_p7 = por %p1461_p6, %p1460_p1 }
 0x26c   : > { %p1463_p9 = pnand %p1462_p7, %p1456_p4 }
 0x26e   : > { %1466 = shalt.err (!%p1463_p9)
}
 0x26f   : > { %1218 = dma.vmem_to_hbm [thread:$0]  (%p2018_p5), %s1907_s30, 128, %s1905_s10, %s804_s22  }
 0x270   : > { %s809_s2 = scalar_lea.sflag [#allocation13], %s1842_s1  ;;  %s1467_s24 = scalar_lea.vmem %s1914_s20, 128 }
 0x271   : > { %p1468_p12 = scmp.ne.s32.totalorder %s1914_s20, %s1467_s24  ;;  %s1558_s18 = smov [#allocation12]  }
 0x272   : > { %s1471_s17 = sshll.u32 %s1558_s18, 4  ;;  %s1472_s17 = int_to_ptr.vmem [resolvable:$false] %s1471_s17 }
 0x273   : > { %p1469_p3 = pnand %p1468_p12, %p2018_p5  ;;  %s1473_s21 = scalar_lea.vmem %s1472_s17, 256 }
 0x274   : > { %p1474_p0 = scmp.lt.s32.totalorder %s1914_s20, %s1472_s17  ;;  %p1475_p2 = scmp.lt.s32.totalorder %s1473_s21, %s1467_s24 }
 0x275   : > { %p1470_p13 = pneg %p1469_p3 }
 0x276   : > { %p1476_p8 = por %p1475_p2, %p1474_p0 }
 0x278   : > { %p1477_p4 = pnand %p1476_p8, %p1470_p13 }
 0x27a   : > { %1480 = shalt.err (!%p1477_p4)
}
 0x27b   : > { %s1481_s1 = scalar_lea.hbm %s1912_s9, 128  ;;  %s1485_s22 = scalar_lea.hbm %s2017_s26, 256 }
 0x27c   : > { %p1482_p10 = scmp.ne.s32.totalorder %s1912_s9, %s1481_s1  ;;  %p1486_p6 = scmp.lt.u32.totalorder %s1912_s9, %s2017_s26 }
 0x27d   : > { %p1487_p7 = scmp.lt.u32.totalorder %s1485_s22, %s1481_s1  ;;  %p1489_p12 = scmp.lt.u32.totalorder %s1481_s1, %s1912_s9 }
 0x27e   : > { %p1483_p11 = pnand %p1482_p10, %p2018_p5 }
 0x27f   : > { %p1488_p9 = por %p1487_p7, %p1486_p6 }
 0x280   : > { %p1484_p1 = pneg %p1483_p11 }
 0x281   : > { %p1490_p3 = por %p1489_p12, %p1488_p9 }
 0x283   : > { %p1491_p13 = pnand %p1490_p3, %p1484_p1 }
 0x285   : > { %1494 = shalt.err (!%p1491_p13)
}
 0x286   : > { %1219 = dma.vmem_to_hbm [thread:$0]  (%p2018_p5), %s1914_s20, 128, %s1912_s9, %s809_s2  }
 0x287 PF: > { %s847_s28 = sand.u32 1, %s1533_s13   ;;  %p2019_p0 = scmp.ne.s32.totalorder %s2007_s12, 0 }
 0x288   : > { %p2020_p2 = scmp.ge.s32.totalorder %s1545_s16, 2  ;;  %s848_s0 = scalar_lea.sflag [#allocation4], %s847_s28 }
 0x28a   : > { %p1240_p8 = pnand %p2020_p2, %p2019_p0 }
 0x28c   : > { %1524 = dma.done.wait (!%p1240_p8), %s848_s0, 128  }
 0x28d   : > { %1526 = vsyncadd (!%p1240_p8), %s848_s0, 4294967168  ;;  %s857_s24 = scalar_lea.sflag [#allocation13], %s847_s28 }
 0x28e   : > { %1528 = dma.done.wait (!%p1240_p8), %s857_s24, 128  }
 0x28f   : > { %1530 = vsyncadd (!%p1240_p8), %s857_s24, 4294967168  ;;  %p29_p5 = scmp.ge.s32.totalorder %s1766_s11, 4   ;;  %s2021_s13 = smov %s1537_s14 }
 0x290   : > { %s2022_s14 = smov %s1541_s15  ;;  %s2023_s15 = smov %s1777_s29 }
 0x291   : > { %s2024_s16 = smov %s1766_s11  ;;  %31 = sbr.rel (!%p29_p5) target bundleno = 15 (0xf), region = 134 }
 0x298   :  { %862 = vsyncpa [#allocation3], 1 }
 0x299   :  { %864 = vsyncpa [#allocation3 + $0x1], 1 }
 0x29a   :  { %865 = vsyncpa [#allocation6], 1 }
 0x29b   :  { %866 = vsyncpa [#allocation9], 1 }
 0x29c   :  { %867 = vsyncpa [#allocation4], 1 }
 0x29d   :  { %869 = vsyncpa [#allocation4 + $0x1], 1 }
 0x29e   :  { %870 = vsyncpa [#allocation13], 1 }
 0x29f   :  { %872 = vsyncpa [#allocation13 + $0x1], 1 }

</bundles_post_ra>
